<compile_context>
chip_gen: v6e
topology: v6e:2x2x1
jax: 0.10.0
libtpu: 0.0.40
codegen_flags: <defaults>
</compile_context>

<pallas_src>
import math

import jax
import jax.numpy as jnp
from jax.experimental import pallas as pl
from jax.experimental.pallas import tpu as pltpu


_NEG_SLOPE = 0.01          # PyTorch nn.LeakyReLU default
_MAX_TILE_B = 512          # batch rows per grid step (measured sweet spot)


def _round_up(a, m):
    return ((a + m - 1) // m) * m


def make_mlp_kernel(num_layers, last_is_scalar):
    """Fused MLP kernel.

    Ref order: (x_ref, w0, b0, w1, b1, ..., out_ref).
    Weights are (in, out) bf16, except the last one when out == 1, which is
    passed as a (1, in) row.  Biases are (1, out) f32.
    """

    def kernel(*refs):
        x_ref = refs[0]
        out_ref = refs[-1]
        params = refs[1:-1]

        # bf16 operands feed the MXU at full rate on v5e/v6e/v7x.
        h = x_ref[...].astype(jnp.bfloat16)

        for i in range(num_layers):
            w_ref = params[2 * i]
            b = params[2 * i + 1][...].astype(jnp.float32)
            last = (i + 1 == num_layers)

            if last and last_is_scalar:
                # (hidden -> 1): VPU multiply + XLU lane reduce.  A 1-lane-
                # wide MXU matmul wastes an MXU pass and serializes on the
                # result FIFO; VPU/XLU run in separate VLIW slots.
                w_row = w_ref[...].astype(jnp.float32)          # (1, hidden)
                y = jnp.sum(h.astype(jnp.float32) * w_row,
                            axis=-1, keepdims=True) + b
            else:
                y = jnp.dot(h, w_ref[...],
                            preferred_element_type=jnp.float32) + b

            if not last:
                # LeakyReLU in f32 on the VPU.
                y = jnp.where(y >= 0.0, y, _NEG_SLOPE * y)
                h = y.astype(jnp.bfloat16)        # next layer's MXU operand
            else:
                # Sigmoid: exp on the EUP; approx reciprocal also on the EUP.
                y = pl.reciprocal(1.0 + jnp.exp(-y), approx=True)
                out_ref[...] = y.astype(out_ref.dtype)

    return kernel


def _vmem_limit_bytes(tile_b, in_dim, widths):
    """Explicit VMEM budget (double-buffered tiles + resident params + live
    activations), with 2x headroom, clamped to [16 MiB, 48 MiB] so it is safe
    on v5e/v6e (128 MiB physical) and v7x (64 MiB physical)."""
    max_w = max([in_dim] + list(widths))
    tile_bytes = 2 * tile_b * in_dim * 4 + 2 * tile_b * widths[-1] * 4
    param_bytes = 0
    last = in_dim
    for w in widths:
        param_bytes += 2 * (last * w * 2 + w * 4)   # bf16 weights, f32 biases
        last = w
    act_bytes = 6 * tile_b * max_w * 4
    need = tile_bytes + param_bytes + act_bytes
    return int(min(max(2 * need, 16 * 1024 * 1024), 48 * 1024 * 1024))


def init_discriminator_params(key, input_dim, layers):
    """Deterministic PyTorch-style (Kaiming-uniform) init.

    Returns [w0, b0, w1, b1, ...] in f32 with weights already transposed to
    (in, out) and biases shaped (1, out).
    """
    params = []
    last = input_dim
    for width in layers:
        key, kw, kb = jax.random.split(key, 3)
        bound = 1.0 / math.sqrt(last)
        w = jax.random.uniform(kw, (last, width), jnp.float32,
                               minval=-bound, maxval=bound)
        b = jax.random.uniform(kb, (1, width), jnp.float32,
                               minval=-bound, maxval=bound)
        params += [w, b]
        last = width
    return params


def discriminator_forward(x, params):
    """Run the fused Pallas MLP.  x: (batch, input_dim) float32."""
    num_layers = len(params) // 2
    batch, in_dim = x.shape
    widths = [params[2 * i].shape[1] for i in range(num_layers)]
    out_dim = widths[-1]
    last_is_scalar = (out_dim == 1)

    # Batch tiling: TILE_B rows per grid step, batch padded to a tile multiple.
    tile_b = min(_MAX_TILE_B, _round_up(batch, 8))
    padded = _round_up(batch, tile_b)
    if padded != batch:
        x = jnp.pad(x, ((0, padded - batch), (0, 0)))
    grid = (padded // tile_b,)

    # Kernel-side params: bf16 weights (MXU operands), f32 biases.  The final
    # (hidden -> 1) weight is pre-shaped to (1, hidden) on the host so the
    # kernel's lane reduction needs no in-kernel relayout.
    kparams = []
    for i in range(num_layers):
        w = params[2 * i]
        b = params[2 * i + 1]
        if i + 1 == num_layers and last_is_scalar:
            w = w.T                                   # (hidden, 1) -> (1, hidden)
        kparams += [w.astype(jnp.bfloat16), b.astype(jnp.float32)]

    in_specs = [pl.BlockSpec((tile_b, in_dim), lambda i: (i, 0))]
    for p in kparams:
        # Full-array block with constant index_map => resident across grid.
        in_specs.append(pl.BlockSpec(p.shape, lambda i: (0, 0)))
    out_specs = pl.BlockSpec((tile_b, out_dim), lambda i: (i, 0))

    out = pl.pallas_call(
        make_mlp_kernel(num_layers, last_is_scalar),
        out_shape=jax.ShapeDtypeStruct((padded, out_dim), jnp.float32),
        grid=grid,
        in_specs=in_specs,
        out_specs=out_specs,
        compiler_params=pltpu.CompilerParams(
            dimension_semantics=("parallel",),
            vmem_limit_bytes=_vmem_limit_bytes(tile_b, in_dim, widths)),
    )(x, *kparams)
    return out[:batch]


def discriminator_reference(x, params):
    """Pure-JAX f32 reference matching the PyTorch module."""
    num_layers = len(params) // 2
    h = x
    for i in range(num_layers):
        w = params[2 * i]
        b = params[2 * i + 1]
        h = h @ w + b
        if i + 1 != num_layers:
            h = jnp.where(h >= 0.0, h, _NEG_SLOPE * h)
        else:
            h = jax.nn.sigmoid(h)
    return h


if __name__ == "__main__":
    # Discriminator(input_dim=16, layers=[32, 32, 1]); small batch of 8.
    input_dim = 16
    layers = [32, 32, 1]

    key = jax.random.PRNGKey(0)
    key, kx, kx2 = jax.random.split(key, 3)
    params = init_discriminator_params(key, input_dim, layers)

    # Small-shape check (batch=8; single grid step).
    x = jax.random.normal(kx, (8, input_dim), jnp.float32)
    out = jax.block_until_ready(discriminator_forward(x, params))
    ref = discriminator_reference(x, params)
    assert out.shape == (8, layers[-1])
    # bf16 MXU operands + approx reciprocal => relaxed tolerance vs f32 ref.
    assert jnp.allclose(out, ref, atol=2e-2, rtol=2e-2), "mismatch (batch=8)"

    # Larger, non-multiple batch exercises the grid + padding path.
    x2 = jax.random.normal(kx2, (1000, input_dim), jnp.float32)
    out2 = jax.block_until_ready(discriminator_forward(x2, params))
    ref2 = discriminator_reference(x2, params)
    assert out2.shape == (1000, layers[-1])
    assert jnp.allclose(out2, ref2, atol=2e-2, rtol=2e-2), "mismatch (batch=1000)"

    print("KERNEL_OK")
</pallas_src>

<mosaic_0001>
module attributes {stable_mosaic.version = 11 : i64} {
  func.func @kernel(%arg0: i32, %arg1: memref<8x16xf32, #tpu.memory_space<vmem>>, %arg2: memref<16x32xbf16, #tpu.memory_space<vmem>>, %arg3: memref<1x32xf32, #tpu.memory_space<vmem>>, %arg4: memref<32x32xbf16, #tpu.memory_space<vmem>>, %arg5: memref<1x32xf32, #tpu.memory_space<vmem>>, %arg6: memref<1x32xbf16, #tpu.memory_space<vmem>>, %arg7: memref<1x1xf32, #tpu.memory_space<vmem>>, %arg8: memref<8x1xf32, #tpu.memory_space<vmem>>) attributes {dimension_semantics = [#tpu.dimension_semantics<parallel>], iteration_bounds = array<i64: 1>, scalar_prefetch = 0 : i64, scratch_operands = 0 : i64, tpu.core_type = #tpu.core_type<tc>, window_params = [{transform_indices = @transform_0, window_bounds = array<i64: 8, 16>}, {pipeline_mode = #tpu.pipeline_mode<synchronous>, transform_indices = @transform_1, window_bounds = array<i64: 16, 32>}, {pipeline_mode = #tpu.pipeline_mode<synchronous>, transform_indices = @transform_2, window_bounds = array<i64: 1, 32>}, {pipeline_mode = #tpu.pipeline_mode<synchronous>, transform_indices = @transform_3, window_bounds = array<i64: 32, 32>}, {pipeline_mode = #tpu.pipeline_mode<synchronous>, transform_indices = @transform_4, window_bounds = array<i64: 1, 32>}, {pipeline_mode = #tpu.pipeline_mode<synchronous>, transform_indices = @transform_5, window_bounds = array<i64: 1, 32>}, {pipeline_mode = #tpu.pipeline_mode<synchronous>, transform_indices = @transform_6, window_bounds = array<i64: 1, 1>}, {transform_indices = @transform_7, window_bounds = array<i64: 8, 1>}]} {
    %c0 = arith.constant 0 : index
    %c0_0 = arith.constant 0 : index
    %0 = vector.load %arg1[%c0, %c0_0] : memref<8x16xf32, #tpu.memory_space<vmem>>, vector<8x16xf32>
    %1 = arith.truncf %0 : vector<8x16xf32> to vector<8x16xbf16>
    %c0_1 = arith.constant 0 : index
    %c0_2 = arith.constant 0 : index
    %2 = vector.load %arg3[%c0_1, %c0_2] : memref<1x32xf32, #tpu.memory_space<vmem>>, vector<1x32xf32>
    %c0_3 = arith.constant 0 : index
    %c0_4 = arith.constant 0 : index
    %3 = vector.load %arg2[%c0_3, %c0_4] : memref<16x32xbf16, #tpu.memory_space<vmem>>, vector<16x32xbf16>
    %cst = arith.constant dense<0.000000e+00> : vector<8x32xf32>
    %4 = tpu.matmul %1, %3, %cst {dimension_numbers = #tpu.dot_dimension_numbers<[1], [0], [0], [1], [0, 0, 1, 1], [], []>} : vector<8x16xbf16>, vector<16x32xbf16>, vector<8x32xf32> -> vector<8x32xf32>
    %5 = vector.broadcast %2 : vector<1x32xf32> to vector<8x32xf32>
    %6 = arith.addf %4, %5 : vector<8x32xf32>
    %cst_5 = arith.constant 0.000000e+00 : f32
    %7 = vector.broadcast %cst_5 : f32 to vector<8x32xf32>
    %8 = arith.cmpf oge, %6, %7 : vector<8x32xf32>
    %cst_6 = arith.constant 0.00999999977 : f32
    %9 = vector.broadcast %cst_6 : f32 to vector<8x32xf32>
    %10 = arith.mulf %9, %6 : vector<8x32xf32>
    %11 = arith.select %8, %6, %10 : vector<8x32xi1>, vector<8x32xf32>
    %12 = arith.truncf %11 : vector<8x32xf32> to vector<8x32xbf16>
    %c0_7 = arith.constant 0 : index
    %c0_8 = arith.constant 0 : index
    %13 = vector.load %arg5[%c0_7, %c0_8] : memref<1x32xf32, #tpu.memory_space<vmem>>, vector<1x32xf32>
    %c0_9 = arith.constant 0 : index
    %c0_10 = arith.constant 0 : index
    %14 = vector.load %arg4[%c0_9, %c0_10] : memref<32x32xbf16, #tpu.memory_space<vmem>>, vector<32x32xbf16>
    %cst_11 = arith.constant dense<0.000000e+00> : vector<8x32xf32>
    %15 = tpu.matmul %12, %14, %cst_11 {dimension_numbers = #tpu.dot_dimension_numbers<[1], [0], [0], [1], [0, 0, 1, 1], [], []>} : vector<8x32xbf16>, vector<32x32xbf16>, vector<8x32xf32> -> vector<8x32xf32>
    %16 = vector.broadcast %13 : vector<1x32xf32> to vector<8x32xf32>
    %17 = arith.addf %15, %16 : vector<8x32xf32>
    %cst_12 = arith.constant 0.000000e+00 : f32
    %18 = vector.broadcast %cst_12 : f32 to vector<8x32xf32>
    %19 = arith.cmpf oge, %17, %18 : vector<8x32xf32>
    %cst_13 = arith.constant 0.00999999977 : f32
    %20 = vector.broadcast %cst_13 : f32 to vector<8x32xf32>
    %21 = arith.mulf %20, %17 : vector<8x32xf32>
    %22 = arith.select %19, %17, %21 : vector<8x32xi1>, vector<8x32xf32>
    %23 = arith.truncf %22 : vector<8x32xf32> to vector<8x32xbf16>
    %c0_14 = arith.constant 0 : index
    %c0_15 = arith.constant 0 : index
    %24 = vector.load %arg7[%c0_14, %c0_15] : memref<1x1xf32, #tpu.memory_space<vmem>>, vector<1x1xf32>
    %c0_16 = arith.constant 0 : index
    %c0_17 = arith.constant 0 : index
    %25 = vector.load %arg6[%c0_16, %c0_17] : memref<1x32xbf16, #tpu.memory_space<vmem>>, vector<1x32xbf16>
    %26 = arith.extf %25 : vector<1x32xbf16> to vector<1x32xf32>
    %27 = arith.extf %23 : vector<8x32xbf16> to vector<8x32xf32>
    %28 = vector.broadcast %26 : vector<1x32xf32> to vector<8x32xf32>
    %29 = arith.mulf %27, %28 : vector<8x32xf32>
    %cst_18 = arith.constant dense<0.000000e+00> : vector<8xf32>
    %30 = vector.multi_reduction <add>, %29, %cst_18 [1] : vector<8x32xf32> to vector<8xf32>
    %31 = vector.shape_cast %30 : vector<8xf32> to vector<8x1xf32>
    %32 = vector.broadcast %24 : vector<1x1xf32> to vector<8x1xf32>
    %33 = arith.addf %31, %32 : vector<8x1xf32>
    %cst_19 = arith.constant 0.000000e+00 : f32
    %34 = vector.broadcast %cst_19 : f32 to vector<8x1xf32>
    %35 = arith.subf %34, %33 : vector<8x1xf32>
    %36 = math.exp %35 : vector<8x1xf32>
    %cst_20 = arith.constant 1.000000e+00 : f32
    %37 = vector.broadcast %cst_20 : f32 to vector<8x1xf32>
    %38 = arith.addf %37, %36 : vector<8x1xf32>
    %39 = tpu.reciprocal %38 {approx = true} : vector<8x1xf32> -> vector<8x1xf32>
    %c0_21 = arith.constant 0 : index
    %c0_22 = arith.constant 0 : index
    %40 = vector.load %arg8[%c0_21, %c0_22] : memref<8x1xf32, #tpu.memory_space<vmem>>, vector<8x1xf32>
    tpu.vector_store %arg8[%c0_21, %c0_22], %39 {strides = array<i32>} : memref<8x1xf32, #tpu.memory_space<vmem>>, vector<8x1xf32>,
    return
  }
  func.func @transform_0(%arg0: i32) -> (i32, i32) {
    %c0_i32 = arith.constant 0 : i32
    %c0_i32_0 = arith.constant 0 : i32
    return %arg0, %c0_i32 : i32, i32
  }
  func.func @transform_1(%arg0: i32) -> (i32, i32) {
    %c0_i32 = arith.constant 0 : i32
    %c0_i32_0 = arith.constant 0 : i32
    %c0_i32_1 = arith.constant 0 : i32
    return %c0_i32, %c0_i32_0 : i32, i32
  }
  func.func @transform_2(%arg0: i32) -> (i32, i32) {
    %c0_i32 = arith.constant 0 : i32
    %c0_i32_0 = arith.constant 0 : i32
    %c0_i32_1 = arith.constant 0 : i32
    return %c0_i32, %c0_i32_0 : i32, i32
  }
  func.func @transform_3(%arg0: i32) -> (i32, i32) {
    %c0_i32 = arith.constant 0 : i32
    %c0_i32_0 = arith.constant 0 : i32
    %c0_i32_1 = arith.constant 0 : i32
    return %c0_i32, %c0_i32_0 : i32, i32
  }
  func.func @transform_4(%arg0: i32) -> (i32, i32) {
    %c0_i32 = arith.constant 0 : i32
    %c0_i32_0 = arith.constant 0 : i32
    %c0_i32_1 = arith.constant 0 : i32
    return %c0_i32, %c0_i32_0 : i32, i32
  }
  func.func @transform_5(%arg0: i32) -> (i32, i32) {
    %c0_i32 = arith.constant 0 : i32
    %c0_i32_0 = arith.constant 0 : i32
    %c0_i32_1 = arith.constant 0 : i32
    return %c0_i32, %c0_i32_0 : i32, i32
  }
  func.func @transform_6(%arg0: i32) -> (i32, i32) {
    %c0_i32 = arith.constant 0 : i32
    %c0_i32_0 = arith.constant 0 : i32
    %c0_i32_1 = arith.constant 0 : i32
    return %c0_i32, %c0_i32_0 : i32, i32
  }
  func.func @transform_7(%arg0: i32) -> (i32, i32) {
    %c0_i32 = arith.constant 0 : i32
    %c0_i32_0 = arith.constant 0 : i32
    return %arg0, %c0_i32 : i32, i32
  }
}

</mosaic_0001>

<bundles_post_ra>
// kernel: tpu_custom_call.1
= control target key start
LH: loop header
LB: loop body
LE: loop exit
PB: predicated region body
PF: predicated region fallthrough
CT: control target
= control target key end

     0   :  { %s414_s0 = inlined_call_operand.hbm [shape: f32[8,16], index: 0, kind: input, shape index: {}]   ;;  %s415_s1 = inlined_call_operand.hbm [shape: bf16[16,32], index: 1, kind: input, shape index: {}]   ;;  %s416_s2 = inlined_call_operand.vmem [shape: f32[1,32], index: 2, kind: input, shape index: {}]   ;;  %s417_s3 = inlined_call_operand.hbm [shape: bf16[32,32], index: 3, kind: input, shape index: {}]   ;;  %s418_s4 = inlined_call_operand.vmem [shape: f32[1,32], index: 4, kind: input, shape index: {}]   ;;  %s419_s5 = inlined_call_operand.vmem [shape: bf16[1,32], index: 5, kind: input, shape index: {}]   ;;  %s420_s6 = inlined_call_operand.<no memory space> [shape: f32[1,1], index: 6, kind: input, shape index: {}]   ;;  %s421_s7 = inlined_call_operand.vmem [shape: f32[8,1], index: 7, kind: output, shape index: {}]  }
   0x1   :  { %v12_v0 = vstv %s420_s6 }
   0x2   :  { %13 = vst [vmem:[#allocation2] sm:$0x1] %v12_v0 }
   0x3   :  { %14 = vsyncpa [#allocation4], 0 }
   0x4   :  { %15 = vsyncpa [#allocation6], 0  ;;  %s341_s26 = smov [#allocation5]  }
   0x5   :  { %s31_s27 = sshll.u32 %s341_s26, 4  ;;  %s32_s27 = int_to_ptr.vmem [resolvable:$true] %s31_s27 }
   0x6   :  { %s285_s28 = scalar_lea.vmem %s32_s27, 128  ;;  %p290_p1 = scmp.lt.s32.totalorder %s32_s27, %s32_s27 }
   0x7   :  { %p286_p0 = scmp.ne.s32.totalorder %s32_s27, %s285_s28  ;;  %p291_p2 = scmp.lt.s32.totalorder %s285_s28, %s285_s28 }
   0x9   :  { %p292_p3 = por %p291_p2, %p290_p1 }
   0xb   :  { %p293_p4 = pnand %p292_p3, %p286_p0 }
   0xd   :  { %296 = shalt.err (!%p293_p4)
}
   0xe   :  { %s342_s29 = smov 64   ;;  %s343_s30 = smov 4  }
   0xf   :  { %37 = dma.hbm_to_vmem [thread:$0]  %s415_s1, 128, %s32_s27, [#allocation6], %s342_s29, %s342_s29, %s343_s30  }
  0x10   :  { %s344_s6 = smov [#allocation3]   ;;  %s345_s11 = smov [#allocation7]  }
  0x11   :  { %s22_s10 = sshll.u32 %s344_s6, 4  ;;  %s45_s12 = sshll.u32 %s345_s11, 4  ;;  %s23_s10 = int_to_ptr.vmem [resolvable:$true] %s22_s10  ;;  %s46_s12 = int_to_ptr.vmem [resolvable:$true] %s45_s12 }
  0x12   :  { %s305_s13 = scalar_lea.vmem %s23_s10, 128  ;;  %p310_p6 = scmp.lt.s32.totalorder %s23_s10, %s23_s10 }
  0x13   :  { %p306_p5 = scmp.ne.s32.totalorder %s23_s10, %s305_s13  ;;  %p311_p7 = scmp.lt.s32.totalorder %s305_s13, %s305_s13 }
  0x15   :  { %p312_p8 = por %p311_p7, %p310_p6 }
  0x17   :  { %p313_p9 = pnand %p312_p8, %p306_p5 }
  0x19   :  { %316 = shalt.err (!%p313_p9)
}
  0x1a   :  { %25 = dma.hbm_to_vmem [thread:$0]  %s414_s0, 128, %s23_s10, [#allocation4]  }
  0x1b   :  { %s325_s16 = scalar_lea.vmem %s46_s12, 256  ;;  %p330_p11 = scmp.lt.s32.totalorder %s46_s12, %s46_s12 }
  0x1c   :  { %p326_p10 = scmp.ne.s32.totalorder %s46_s12, %s325_s16  ;;  %p331_p12 = scmp.lt.s32.totalorder %s325_s16, %s325_s16 }
  0x1e   :  { %p332_p13 = por %p331_p12, %p330_p11 }
  0x20   :  { %p333_p0 = pnand %p332_p13, %p326_p10 }
  0x22   :  { %336 = shalt.err (!%p333_p0)
}
  0x23   :  { %51 = dma.hbm_to_vmem [thread:$0]  %s417_s3, 256, %s46_s12, [#allocation6], %s342_s29, %s342_s29, %s343_s30  }
  0x24   :  { %337 = dma.done.wait [#allocation4], 128  }
  0x25   :  { %338 = vsyncadd [#allocation4], 4294967168 }
  0x26   :  { %339 = dma.done.wait [#allocation6], 384  }
  0x27   :  { %340 = vsyncadd [#allocation6], 4294966912  ;;  %v346_v1 = vmov 0.0   ;;  %vm347_vm0 = vmmov 0   ;;  %v270_v2 = vld [vmem:[#allocation5] sm:$0xff]   ;;  %v68_v3 = vld [vmem:[#allocation3] sm:$0xff]  ;;  %v208_v16 = vlaneseq }
  0x28   :  { %249 = vmatprep.subr.bf16.mxu0 %v346_v1  ;;  %251 = vmatprep.mubr.msk.bf16.mxu0 %vm347_vm0, %v346_v1  ;;  %vm85_vm1 = vcmask 130048   ;;  %v69_v4 = vpack.c.bf16 %v68_v3, %v68_v3  ;;  %v271_v5 = vld [vmem:[#allocation7 + $0x8] sm:$0xff]   ;;  %v272_v6 = vld [vmem:[#allocation7] sm:$0xff]   ;;  %vm156_vm3 = vcmask 261120   ;;  %vm228_vm5 = vcmask 7168  }
  0x29   :  { %255 = vmatprep.subr.bf16.mxu1 %v346_v1  ;;  %259 = vmatprep.mubr.msk.bf16.mxu1 %vm347_vm0, %v346_v1  ;;  %v236_v7 = vld [vmem:[%s416_s2] ss:$0 sm:$0xff]  ;;  %v209_v18 = vshrl.u32 %v208_v16, 7 }
  0x2a   :  { %250 = vmatpush3.bf16.msra.mxu0 %v270_v2  ;;  %256 = vmatpush3.bf16.msra.mxu1 %v271_v5  ;;  %v239_v17 = vld [vmem:[%s418_s4] ss:$0 sm:$0xff] }
  0x2b   :  { %257 = vmatprep.subr.bf16.mxu1 %v346_v1  ;;  %v205_v19 = vld [vmem:[%s419_s5] sm:$0x1]  ;;  %v210_v24 = vsub.s32 0, %v209_v18 }
  0x2c   :  { %v206_v23 = vunpack.c.l.bf16 %v205_v19  ;;  %v243_v34 = vld [vmem:[#allocation2] ss:$0 sm:$0xff] }
  0x2d   :  { %252 = vmatmul.mubr.msk.bf16.vlgmr.msra.gmra.mxu0 %vm85_vm1, %v69_v4 }
  0x2e   :  { %258 = vmatpush3.bf16.msra.mxu1 %v272_v6  ;;  %v211_v30 = vrot.slane %v206_v23, %v210_v24 }
  0xed   :  { %v123_v8 = vpop.f32.mrf.mxu0 }
  0xee   :  { %v124_v9 = vadd.f32 %v236_v7, %v123_v8 }
  0xef   :  { %v253_v10 = vpop.f32.mrf.mxu0 }
  0xf0   :  { %vm129_vm2 = vcmp.ge.f32.partialorder %v124_v9, 0.0  ;;  %v130_v11 = vmul.f32 0.01, %v124_v9 }
  0xf1   :  { %v126_v12 = vpop.f32.mrf.mxu0 }
  0xf2   :  { %v131_v13 = vsel %vm129_vm2, %v124_v9, %v130_v11 }
  0xf3   :  { %v132_v14 = vpack.c.bf16 %v131_v13, %v131_v13  ;;  %v254_v15 = vpop.f32.mrf.mxu0 }
  0xf5   :  { %260 = vmatmul.mubr.msk.bf16.vlgmr.msra.gmra.mxu1 %vm156_vm3, %v132_v14 }
 0x1b5   :  { %v194_v20 = vpop.f32.mrf.mxu1 }
 0x1b6   :  { %v195_v21 = vadd.f32 %v239_v17, %v194_v20 }
 0x1b7   :  { %v261_v22 = vpop.f32.mrf.mxu1 }
 0x1b8   :  { %vm200_vm4 = vcmp.ge.f32.partialorder %v195_v21, 0.0  ;;  %v201_v25 = vmul.f32 0.01, %v195_v21 }
 0x1b9   :  { %v197_v26 = vpop.f32.mrf.mxu1 }
 0x1ba   :  { %v202_v27 = vsel %vm200_vm4, %v195_v21, %v201_v25 }
 0x1bb   :  { %v262_v28 = vpop.f32.mrf.mxu1  ;;  %v203_v29 = vpack.c.bf16 %v202_v27, %v202_v27 }
 0x1bd   :  { %v207_v31 = vunpack.c.l.bf16 %v203_v29 }
 0x1bf   :  { %v212_v32 = vmul.f32 %v211_v30, %v207_v31 }
 0x1c1   :  { %v213_v33 = vsel %vm156_vm3, %v212_v32, 0.0 }
 0x1c2   :  { %214 = vadd.xlane.f32.xlu0 %v213_v33 }
 0x24b   :  { %v215_v35 = vpop.xlane.xlu0 %214 }
 0x24c   :  { %v222_v36 = vadd.f32 %v243_v34, %v215_v35 }
 0x24e   :  { %v223_v37 = vsub.f32 0.0, %v222_v36 }
 0x250   :  { %v224_v38 = vmul.f32 1.442695, %v223_v37 }
 0x252   :  { %273 = vpow2.f32 %v224_v38 }
 0x25f   :  { %v274_v39 = vpop.eup %273 }
 0x260   :  { %v226_v40 = vadd.f32 1.0, %v274_v39 }
 0x262   :  { %275 = vrcp.f32 %v226_v40 }
 0x26f   :  { %v276_v41 = vpop.eup %275 }
 0x270   :  { %229 = vst.msk [vmem:[%s421_s7] sm:$0xff] %vm228_vm5, %v276_v41 }
 0x271   :  { %234 = vsyncpa [#allocation4], 1 }
 0x272   :  { %235 = vsyncpa [#allocation6], 1 }

</bundles_post_ra>
